<compile_context>
chip_gen: v7x
topology: tpu7x:2x2x1
jax: 0.10.0
libtpu: 0.0.40
codegen_flags: <defaults>
</compile_context>

<pallas_src>
import functools

import jax
import jax.numpy as jnp
from jax import lax
from jax.experimental import pallas as pl
from jax.experimental.pallas import tpu as pltpu


def _round_up(v: int, m: int) -> int:
    return (v + m - 1) // m * m


def _pad_to(arr, shape):
    pads = [(0, t - s) for s, t in zip(arr.shape, shape)]
    if any(p for _, p in pads):
        arr = jnp.pad(arr, pads)
    return arr


def _mlp2_kernel(seed_ref, x_ref, w1_ref, b1_ref, w2_ref, b2_ref, o_ref,
                 *, dropout_p: float, training: bool, tile_n: int):
    # Layer 1 on the MXU: (TILE_N, IN) . (HID, IN)^T -> (TILE_N, HID), f32 acc.
    h = lax.dot_general(
        x_ref[...], w1_ref[...],
        dimension_numbers=(((1,), (1,)), ((), ())),
        preferred_element_type=jnp.float32)
    h = jnp.maximum(h + b1_ref[...], 0.0)

    # Dropout (matches F.dropout(p, training) in expectation; not bit-matched to
    # torch RNG). Counter-based hash (murmur3 finalizer) of the *global* element
    # index mixed with the seed: pure vector integer ops (no pltpu.prng_* state),
    # so it works on hardware and in interpret mode; different tiles / nearby
    # seeds are decorrelated. The 1/(1-p) scale is folded into W2 in the wrapper.
    if training and dropout_p >= 1.0:
        h = jnp.zeros_like(h)
    elif training and dropout_p > 0.0:
        hid = h.shape[1]
        row = lax.broadcasted_iota(jnp.int32, h.shape, 0).astype(jnp.uint32)
        col = lax.broadcasted_iota(jnp.int32, h.shape, 1).astype(jnp.uint32)
        tile_off = (pl.program_id(0) * tile_n).astype(jnp.uint32)
        gidx = (row + tile_off) * jnp.uint32(hid) + col
        seed_u = seed_ref[0].astype(jnp.uint32)
        bits = gidx ^ (seed_u * jnp.uint32(0x9E3779B9))
        bits = bits ^ (bits >> 16)
        bits = bits * jnp.uint32(0x85EBCA6B)
        bits = bits ^ (bits >> 13)
        bits = bits * jnp.uint32(0xC2B2AE35)
        bits = bits ^ (bits >> 16)
        thresh = jnp.uint32(min(int(dropout_p * (1 << 32)), (1 << 32) - 1))
        h = jnp.where(bits >= thresh, h, jnp.float32(0.0))   # P(keep) = 1 - p

    # Layer 2 transposed so the store is lane-dense:
    # (OUT, HID) . (TILE_N, HID)^T -> (OUT, TILE_N)
    y = lax.dot_general(
        w2_ref[...], h.astype(w2_ref.dtype),
        dimension_numbers=(((1,), (1,)), ((), ())),
        preferred_element_type=jnp.float32)
    o_ref[...] = jax.nn.sigmoid(y + b2_ref[...])


def mlp_two_layers(features, w1, b1, w2, b2, *, dropout_p=0.5, training=False,
                   seed=0, compute_dtype=jnp.bfloat16, max_tile_n=8192):
    """Pallas forward of MLPTwoLayers.

    features: (N, input_dim)
    w1: (hidden_dim, input_dim)  b1: (hidden_dim,)     [PyTorch nn.Linear layout]
    w2: (output_dim, hidden_dim) b2: (output_dim,)
    returns: (N * output_dim,) f32, sigmoid activated (matches torch forward).
    """
    features = jnp.asarray(features)
    n, input_dim = features.shape
    hidden_dim = int(w1.shape[0])
    output_dim = int(w2.shape[0])
    dropout_p = float(dropout_p)
    training = bool(training)

    # Pad ragged contraction dims above 128 to multiples of 128 (full MXU tiles).
    # Zero padding is exact: padded x/W columns contribute 0, padded hidden rows
    # give relu(0)=0 and hit zero W2 columns.
    def _align(d):
        return d if (d <= 128 or d % 128 == 0) else _round_up(d, 128)
    in_p = _align(input_dim)
    hid_p = _align(hidden_dim)

    # --- generation-aware VMEM sizing -------------------------------------
    try:
        vmem_cap = int(pltpu.get_tpu_info().vmem_capacity_bytes)
    except Exception:  # no TPU visible (e.g. interpret mode): assume 128 MiB class
        vmem_cap = 128 * 1024 * 1024
    vmem_limit = int(min(vmem_cap * 3 // 4, 96 * 1024 * 1024))  # 96 MiB v5e/v6e, 48 MiB v7x
    working_set = vmem_limit // 2                               # ~48 / ~24 MiB target

    itemsize = jnp.dtype(compute_dtype).itemsize
    # Resident weights/biases: single-buffered (pl.Buffered(1) below).
    weight_bytes = ((hid_p * in_p + output_dim * hid_p) * itemsize
                    + (hid_p + output_dim) * 4)
    # Streamed bytes per batch row: double-buffered x and (transposed) output,
    # plus the f32 h intermediate and its compute-dtype cast.
    per_row_bytes = (2 * in_p * itemsize
                     + 2 * output_dim * 4
                     + hid_p * (4 + itemsize))
    budget = max(working_set - weight_bytes, 0)
    tile_n = (budget // per_row_bytes) // 128 * 128

    # Keep >= ~4 grid steps (>=2 per TensorCore on v7x) so pipelining / megacore
    # sharding have work to overlap.
    n_pad128 = _round_up(n, 128)
    step_cap = max(128, (n_pad128 // 4) // 128 * 128)
    tile_n = int(max(128, min(tile_n, int(max_tile_n), step_cap)))

    n_pad = _round_up(n, tile_n)
    grid = (n_pad // tile_n,)

    # --- operand preparation ----------------------------------------------
    x = _pad_to(features.astype(jnp.float32), (n_pad, in_p)).astype(compute_dtype)
    w1_f = _pad_to(jnp.asarray(w1, jnp.float32), (hid_p, in_p))
    w2_f = _pad_to(jnp.asarray(w2, jnp.float32), (output_dim, hid_p))
    if training and 0.0 < dropout_p < 1.0:
        w2_f = w2_f * jnp.float32(1.0 / (1.0 - dropout_p))  # fold dropout scale
    w1_c = w1_f.astype(compute_dtype)                        # (HID_P, IN_P)
    w2_c = w2_f.astype(compute_dtype)                        # (OUT, HID_P)
    b1_r = _pad_to(jnp.asarray(b1, jnp.float32), (hid_p,))[None, :]   # (1, HID_P)
    b2_c = jnp.asarray(b2, jnp.float32)[:, None]                      # (OUT, 1)
    seed_arr = jnp.asarray([seed], jnp.int32)

    kernel = functools.partial(_mlp2_kernel, dropout_p=dropout_p,
                               training=training, tile_n=tile_n)

    resident = pl.Buffered(1)   # constant blocks: no second buffer needed
    out_t = pl.pallas_call(
        kernel,
        out_shape=jax.ShapeDtypeStruct((output_dim, n_pad), jnp.float32),
        grid_spec=pltpu.PrefetchScalarGridSpec(
            num_scalar_prefetch=0,
            grid=grid,
            in_specs=[
                pl.BlockSpec(memory_space=pltpu.MemorySpace.SMEM),        # seed
                pl.BlockSpec((tile_n, in_p), lambda i: (i, 0)),           # x tile
                pl.BlockSpec((hid_p, in_p), lambda i: (0, 0),
                             pipeline_mode=resident),                     # W1
                pl.BlockSpec((1, hid_p), lambda i: (0, 0),
                             pipeline_mode=resident),                     # b1
                pl.BlockSpec((output_dim, hid_p), lambda i: (0, 0),
                             pipeline_mode=resident),                     # W2
                pl.BlockSpec((output_dim, 1), lambda i: (0, 0),
                             pipeline_mode=resident),                     # b2
            ],
            out_specs=pl.BlockSpec((output_dim, tile_n), lambda i: (0, i)),
        ),
        compiler_params=pltpu.CompilerParams(
            dimension_semantics=("parallel",),
            vmem_limit_bytes=vmem_limit),
    )(seed_arr, x, w1_c, b1_r, w2_c, b2_c)

    # out_t is y^T (OUT, n_pad). Undo transpose/padding and flatten row-major,
    # matching torch's x.reshape(-1); sigmoid already applied elementwise.
    return out_t.T[:n].reshape(-1)


def _init_linear(key, in_dim, out_dim):
    # Matches nn.Linear default init: U(-1/sqrt(in_dim), 1/sqrt(in_dim)).
    kw, kb = jax.random.split(key)
    bound = 1.0 / (in_dim ** 0.5)
    w = jax.random.uniform(kw, (out_dim, in_dim), jnp.float32, -bound, bound)
    b = jax.random.uniform(kb, (out_dim,), jnp.float32, -bound, bound)
    return w, b


if __name__ == "__main__":
    key = jax.random.PRNGKey(0)
    k_x, k_l1, k_l2, k_x2, k_l3, k_l4 = jax.random.split(key, 6)

    # Case 1: small dims (N=200 not a tile multiple -> padding + 2-step grid),
    # f32 streaming for a tight-ish numeric check.
    N, IN, HID, OUT = 200, 16, 32, 1
    x = jax.random.normal(k_x, (N, IN), jnp.float32)
    w1, b1 = _init_linear(k_l1, IN, HID)
    w2, b2 = _init_linear(k_l2, HID, OUT)

    out = jax.block_until_ready(
        mlp_two_layers(x, w1, b1, w2, b2, dropout_p=0.5, training=False,
                       compute_dtype=jnp.float32))
    ref = jax.nn.sigmoid(
        (jnp.maximum(x @ w1.T + b1, 0.0) @ w2.T + b2).reshape(-1))
    assert out.shape == (N * OUT,)
    # 2e-3: kernel (MXU) and XLA reference may use different default f32 matmul
    # precisions on TPU hardware; exact in interpret mode.
    assert jnp.allclose(out, ref, atol=2e-3, rtol=2e-3), "f32 eval-mode mismatch"

    # Case 2: default bf16 streaming (production path), looser tolerance.
    out_bf16 = jax.block_until_ready(
        mlp_two_layers(x, w1, b1, w2, b2, dropout_p=0.5, training=False))
    assert out_bf16.shape == (N * OUT,)
    assert jnp.allclose(out_bf16, ref, atol=5e-2, rtol=5e-2), "bf16 eval-mode mismatch"

    # Case 3: ragged dims > 128 exercise the 128-alignment padding, OUT > 1
    # exercises the multi-row transposed output slab.
    N2, IN2, HID2, OUT2 = 160, 200, 300, 3
    x2 = jax.random.normal(k_x2, (N2, IN2), jnp.float32)
    w1b, b1b = _init_linear(k_l3, IN2, HID2)
    w2b, b2b = _init_linear(k_l4, HID2, OUT2)
    out2 = jax.block_until_ready(
        mlp_two_layers(x2, w1b, b1b, w2b, b2b, training=False,
                       compute_dtype=jnp.float32))
    ref2 = jax.nn.sigmoid(
        (jnp.maximum(x2 @ w1b.T + b1b, 0.0) @ w2b.T + b2b).reshape(-1))
    assert out2.shape == (N2 * OUT2,)
    assert jnp.allclose(out2, ref2, atol=2e-3, rtol=2e-3), "padded-dims mismatch"

    # Case 4: training mode (dropout active). Not bit-matched to torch RNG;
    # check shape / finiteness / sigmoid range.
    out_tr = jax.block_until_ready(
        mlp_two_layers(x, w1, b1, w2, b2, dropout_p=0.5, training=True,
                       seed=123, compute_dtype=jnp.float32))
    assert out_tr.shape == (N * OUT,)
    assert bool(jnp.all(jnp.isfinite(out_tr)))
    assert bool(jnp.all((out_tr >= 0.0) & (out_tr <= 1.0)))

    print("KERNEL_OK")
</pallas_src>

<mosaic_0001>
module attributes {stable_mosaic.version = 11 : i64} {
  func.func @_mlp2_kernel(%arg0: i32, %arg1: memref<1xi32, #tpu.memory_space<smem>>, %arg2: memref<128x16xf32, #tpu.memory_space<vmem>>, %arg3: memref<32x16xf32, #tpu.memory_space<vmem>>, %arg4: memref<1x32xf32, #tpu.memory_space<vmem>>, %arg5: memref<1x32xf32, #tpu.memory_space<vmem>>, %arg6: memref<1x1xf32, #tpu.memory_space<vmem>>, %arg7: memref<1x128xf32, #tpu.memory_space<vmem>>) attributes {dimension_semantics = [#tpu.dimension_semantics<parallel>], iteration_bounds = array<i64: 2>, scalar_prefetch = 0 : i64, scratch_operands = 0 : i64, tpu.core_type = #tpu.core_type<tc>, window_params = [{transform_indices = @transform_0, window_bounds = array<i64: 1>}, {transform_indices = @transform_1, window_bounds = array<i64: 128, 16>}, {pipeline_mode = #tpu.pipeline_mode<synchronous>, transform_indices = @transform_2, window_bounds = array<i64: 32, 16>}, {pipeline_mode = #tpu.pipeline_mode<synchronous>, transform_indices = @transform_3, window_bounds = array<i64: 1, 32>}, {pipeline_mode = #tpu.pipeline_mode<synchronous>, transform_indices = @transform_4, window_bounds = array<i64: 1, 32>}, {pipeline_mode = #tpu.pipeline_mode<synchronous>, transform_indices = @transform_5, window_bounds = array<i64: 1, 1>}, {transform_indices = @transform_6, window_bounds = array<i64: 1, 128>}]} {
    %c0 = arith.constant 0 : index
    %c0_0 = arith.constant 0 : index
    %0 = vector.load %arg2[%c0, %c0_0] : memref<128x16xf32, #tpu.memory_space<vmem>>, vector<128x16xf32>
    %c0_1 = arith.constant 0 : index
    %c0_2 = arith.constant 0 : index
    %1 = vector.load %arg3[%c0_1, %c0_2] : memref<32x16xf32, #tpu.memory_space<vmem>>, vector<32x16xf32>
    %cst = arith.constant dense<0.000000e+00> : vector<128x32xf32>
    %2 = tpu.matmul %0, %1, %cst {dimension_numbers = #tpu.dot_dimension_numbers<[1], [1], [0], [0], [0, 0, 1, 0], [], []>} : vector<128x16xf32>, vector<32x16xf32>, vector<128x32xf32> -> vector<128x32xf32>
    %c0_3 = arith.constant 0 : index
    %c0_4 = arith.constant 0 : index
    %3 = vector.load %arg4[%c0_3, %c0_4] : memref<1x32xf32, #tpu.memory_space<vmem>>, vector<1x32xf32>
    %4 = vector.broadcast %3 : vector<1x32xf32> to vector<128x32xf32>
    %5 = arith.addf %2, %4 : vector<128x32xf32>
    %cst_5 = arith.constant 0.000000e+00 : f32
    %6 = vector.broadcast %cst_5 : f32 to vector<128x32xf32>
    %7 = arith.maximumf %5, %6 : vector<128x32xf32>
    %c0_6 = arith.constant 0 : index
    %c0_7 = arith.constant 0 : index
    %8 = vector.load %arg5[%c0_6, %c0_7] : memref<1x32xf32, #tpu.memory_space<vmem>>, vector<1x32xf32>
    %cst_8 = arith.constant dense<0.000000e+00> : vector<1x128xf32>
    %9 = tpu.matmul %8, %7, %cst_8 {dimension_numbers = #tpu.dot_dimension_numbers<[1], [1], [0], [0], [0, 0, 1, 0], [], []>} : vector<1x32xf32>, vector<128x32xf32>, vector<1x128xf32> -> vector<1x128xf32>
    %c0_9 = arith.constant 0 : index
    %c0_10 = arith.constant 0 : index
    %10 = vector.load %arg6[%c0_9, %c0_10] : memref<1x1xf32, #tpu.memory_space<vmem>>, vector<1x1xf32>
    %11 = vector.broadcast %10 : vector<1x1xf32> to vector<1x128xf32>
    %12 = arith.addf %9, %11 : vector<1x128xf32>
    %13 = arith.negf %12 : vector<1x128xf32>
    %14 = math.exp %13 : vector<1x128xf32>
    %cst_11 = arith.constant 1.000000e+00 : f32
    %15 = vector.broadcast %cst_11 : f32 to vector<1x128xf32>
    %16 = arith.addf %15, %14 : vector<1x128xf32>
    %17 = arith.divf %15, %16 : vector<1x128xf32>
    %c0_12 = arith.constant 0 : index
    %c0_13 = arith.constant 0 : index
    %18 = vector.load %arg7[%c0_12, %c0_13] : memref<1x128xf32, #tpu.memory_space<vmem>>, vector<1x128xf32>
    tpu.vector_store %arg7[%c0_12, %c0_13], %17 {strides = array<i32>} : memref<1x128xf32, #tpu.memory_space<vmem>>, vector<1x128xf32>,
    return
  }
  func.func @transform_0(%arg0: i32) -> i32 {
    %c0_i32 = arith.constant 0 : i32
    %c0_i32_0 = arith.constant 0 : i32
    return %c0_i32 : i32
  }
  func.func @transform_1(%arg0: i32) -> (i32, i32) {
    %c0_i32 = arith.constant 0 : i32
    %c0_i32_0 = arith.constant 0 : i32
    return %arg0, %c0_i32 : i32, i32
  }
  func.func @transform_2(%arg0: i32) -> (i32, i32) {
    %c0_i32 = arith.constant 0 : i32
    %c0_i32_0 = arith.constant 0 : i32
    %c0_i32_1 = arith.constant 0 : i32
    return %c0_i32, %c0_i32_0 : i32, i32
  }
  func.func @transform_3(%arg0: i32) -> (i32, i32) {
    %c0_i32 = arith.constant 0 : i32
    %c0_i32_0 = arith.constant 0 : i32
    %c0_i32_1 = arith.constant 0 : i32
    return %c0_i32, %c0_i32_0 : i32, i32
  }
  func.func @transform_4(%arg0: i32) -> (i32, i32) {
    %c0_i32 = arith.constant 0 : i32
    %c0_i32_0 = arith.constant 0 : i32
    %c0_i32_1 = arith.constant 0 : i32
    return %c0_i32, %c0_i32_0 : i32, i32
  }
  func.func @transform_5(%arg0: i32) -> (i32, i32) {
    %c0_i32 = arith.constant 0 : i32
    %c0_i32_0 = arith.constant 0 : i32
    %c0_i32_1 = arith.constant 0 : i32
    return %c0_i32, %c0_i32_0 : i32, i32
  }
  func.func @transform_6(%arg0: i32) -> (i32, i32) {
    %c0_i32 = arith.constant 0 : i32
    %c0_i32_0 = arith.constant 0 : i32
    return %c0_i32, %arg0 : i32, i32
  }
}

</mosaic_0001>

<bundles_post_ra>
// kernel: tpu_custom_call.1
= control target key start
LH: loop header
LB: loop body
LE: loop exit
PB: predicated region body
PF: predicated region fallthrough
CT: control target
= control target key end

     0   :  { %s1674_s0 = inlined_call_operand.<no memory space> [shape: s32[1], index: 0, kind: input, shape index: {}]   ;;  %s1675_s1 = inlined_call_operand.hbm [shape: f32[256,16], index: 1, kind: input, shape index: {}]   ;;  %s1676_s2 = inlined_call_operand.hbm [shape: f32[32,16], index: 2, kind: input, shape index: {}]   ;;  %s1677_s3 = inlined_call_operand.hbm [shape: f32[1,32], index: 3, kind: input, shape index: {}]   ;;  %s1678_s4 = inlined_call_operand.hbm [shape: f32[1,32], index: 4, kind: input, shape index: {}]   ;;  %s1679_s5 = inlined_call_operand.<no memory space> [shape: f32[1,1], index: 5, kind: input, shape index: {}]   ;;  %s1680_s6 = inlined_call_operand.hbm [shape: f32[1,256], index: 6, kind: output, shape index: {}]  }
   0x1   :  { %v12_v0 = vstv %s1679_s5 }
   0x2   :  { %13 = vst [vmem:[#allocation3] sm:$0x1] %v12_v0 }
   0x3   :  { %14 = vsyncpa [#allocation5], 0 }
   0x4   :  { %16 = vsyncpa [#allocation5 + $0x1], 0 }
   0x5   :  { %17 = vsyncpa [#allocation8], 0 }
   0x6   :  { %18 = vsyncpa [#allocation11], 0 }
   0x7   :  { %19 = vsyncpa [#allocation6], 0 }
   0x8   :  { %21 = vsyncpa [#allocation6 + $0x1], 0  ;;  %s1342_s22 = smov 0   ;;  %s1344_s23 = smov 0  }
   0x9   :  { %s1346_s24 = smov 0   ;;  %s1348_s25 = smov 0  }
   0xa LB: > { %s1363_s5 = sadd.s32 4294967295, %s1291_s25   ;;  %s810_s26 = sadd.s32 4294967294, %s1291_s25   ;;  %s1291_s25 = sphi %s1348_s25, %s1705_s25   ;;  %s1287_s24 = sphi %s1346_s24, %s1704_s24   ;;  %s1283_s23 = sphi %s1344_s23, %s1703_s23   ;;  %s1279_s22 = sphi %s1342_s22, %s1702_s22  }
   0xb   : > { %p68_p0 = scmp.ne.s32.totalorder %s1283_s23, %s1279_s22  ;;  %p1681_p1 = scmp.eq.s32.totalorder %s1363_s5, 0 }
   0xc   : > { %p182_p3 = scmp.eq.s32.totalorder %s810_s26, 1  ;;  %p811_p5 = scmp.ge.s32.totalorder %s1291_s25, 1 }
   0xd   : > { %p1372_p4 = por %p1681_p1, %p68_p0  ;;  %p189_p7 = scmp.lt.s32.totalorder %s1291_s25, 3 }
   0xe   : > { %p1377_p6 = por %p182_p3, %p68_p0  ;;  %s1293_s30 = smov [#allocation7]  }
   0xf   : > { %s1684_s27 = scalar_select %p1372_p4, 1, 0 }
  0x10   : > { %s1685_s28 = scalar_select %p1377_p6, 1, 0 }
  0x11   : > { %p1382_p8 = pnand %p811_p5, %p189_p7  ;;  %s204_s7 = sshll.u32 %s1293_s30, 4  ;;  %s1386_s7 = int_to_ptr.vmem [resolvable:$true] %s204_s7 }
  0x12   : > { %s1294_s9 = smov [#allocation9]   ;;  %s1295_s11 = smov [#allocation10]  }
  0x13   : > { %s1686_s29 = scalar_select %p1382_p8, 1, 0 }
  0x14   : > { %p1031_p9 = pneg %p1382_p8  ;;  %s218_s10 = sshll.u32 %s1294_s9, 4  ;;  %s1397_s10 = int_to_ptr.vmem [resolvable:$true] %s218_s10 }
  0x15   : > { %s1399_s12 = sshll.u32 %s1295_s11, 4  ;;  %s1103_s15 = scalar_lea.hbm %s1676_s2, 512  ;;  %s230_s12 = int_to_ptr.vmem [resolvable:$true] %s1399_s12 }
  0x16   : > { %p1393_p11 = pnand %p1031_p9, %p1681_p1  ;;  %p1104_p12 = scmp.ne.s32.totalorder %s1676_s2, %s1103_s15 }
  0x17   : > { %p1110_p5 = scmp.lt.u32.totalorder %s1103_s15, %s1676_s2 }
  0x18   : > { %p1409_p13 = pneg %p1393_p11 }
  0x1a   : > { %p1106_p0 = pnand %p1409_p13, %p1104_p12 }
  0x1c   : > { %p1107_p3 = pneg %p1106_p0 }
  0x1e   : > { %p1112_p7 = pnand %p1110_p5, %p1107_p3 }
  0x20   : > { %1115 = shalt.err (!%p1112_p7)
}
  0x21   : > { %s1116_s21 = scalar_lea.vmem %s1386_s7, 512  ;;  %p1124_p2 = scmp.lt.s32.totalorder %s1386_s7, %s1386_s7 }
  0x22   : > { %p1117_p9 = scmp.ne.s32.totalorder %s1386_s7, %s1116_s21  ;;  %p1125_p6 = scmp.lt.s32.totalorder %s1116_s21, %s1116_s21 }
  0x24   : > { %p1119_p10 = pnand %p1117_p9, %p1409_p13  ;;  %p1126_p12 = por %p1125_p6, %p1124_p2 }
  0x26   : > { %p1120_p1 = pneg %p1119_p10 }
  0x28   : > { %p1127_p0 = pnand %p1126_p12, %p1120_p1 }
  0x2a   : > { %1130 = shalt.err (!%p1127_p0)
}
  0x2b   : > { %s1296_s0 = smov 128   ;;  %s1297_s26 = smov 8  }
  0x2c   : > { %1034 = dma.hbm_to_vmem [thread:$0]  (!%p1393_p11), %s1676_s2, 512, %s1386_s7, [#allocation8], %s1296_s0, %s1296_s0, %s1297_s26  }
  0x2d   : > { %s1131_s14 = scalar_lea.hbm %s1677_s3, 16 }
  0x2e   : > { %p1132_p1 = scmp.ne.s32.totalorder %s1677_s3, %s1131_s14  ;;  %p1138_p10 = scmp.lt.u32.totalorder %s1131_s14, %s1677_s3 }
  0x30   : > { %p1134_p2 = pnand %p1132_p1, %p1409_p13 }
  0x32   : > { %p1135_p6 = pneg %p1134_p2 }
  0x34   : > { %p1140_p3 = pnand %p1138_p10, %p1135_p6 }
  0x36   : > { %1143 = shalt.err (!%p1140_p3)
}
  0x37   : > { %s1144_s7 = scalar_lea.vmem %s1397_s10, 16  ;;  %s1151_s20 = scalar_lea.vmem %s1397_s10, 32 }
  0x38   : > { %p1145_p5 = scmp.ne.s32.totalorder %s1397_s10, %s1144_s7  ;;  %p1152_p12 = scmp.lt.s32.totalorder %s1397_s10, %s1397_s10 }
  0x39   : > { %p1153_p0 = scmp.lt.s32.totalorder %s1151_s20, %s1144_s7 }
  0x3a   : > { %p1147_p7 = pnand %p1145_p5, %p1409_p13 }
  0x3b   : > { %p1154_p1 = por %p1153_p0, %p1152_p12 }
  0x3c   : > { %p1148_p9 = pneg %p1147_p7 }
  0x3e   : > { %p1155_p2 = pnand %p1154_p1, %p1148_p9 }
  0x40   : > { %1158 = shalt.err (!%p1155_p2)
}
  0x41   : > { %1037 = dma.hbm_to_vmem [thread:$0]  (!%p1393_p11), %s1677_s3, 16, %s1397_s10, [#allocation8]  }
  0x42   : > { %s1159_s13 = scalar_lea.hbm %s1678_s4, 16 }
  0x43   : > { %p1160_p6 = scmp.ne.s32.totalorder %s1678_s4, %s1159_s13  ;;  %p1166_p5 = scmp.lt.u32.totalorder %s1159_s13, %s1678_s4 }
  0x45   : > { %p1162_p10 = pnand %p1160_p6, %p1409_p13 }
  0x47   : > { %p1163_p3 = pneg %p1162_p10 }
  0x49   : > { %p1168_p7 = pnand %p1166_p5, %p1163_p3 }
  0x4b   : > { %1171 = shalt.err (!%p1168_p7)
}
  0x4c   : > { %s1172_s19 = scalar_lea.vmem %s230_s12, 16  ;;  %s1179_s10 = scalar_lea.vmem %s230_s12, 32 }
  0x4d   : > { %p1173_p9 = scmp.ne.s32.totalorder %s230_s12, %s1172_s19  ;;  %p1180_p1 = scmp.lt.s32.totalorder %s230_s12, %s230_s12 }
  0x4e   : > { %p1181_p2 = scmp.lt.s32.totalorder %s1179_s10, %s1172_s19 }
  0x4f   : > { %p1175_p12 = pnand %p1173_p9, %p1409_p13 }
  0x50   : > { %p1182_p4 = por %p1181_p2, %p1180_p1 }
  0x51   : > { %p1176_p0 = pneg %p1175_p12 }
  0x53   : > { %p1183_p8 = pnand %p1182_p4, %p1176_p0 }
  0x55   : > { %1186 = shalt.err (!%p1183_p8)
}
  0x56   : > { %1040 = dma.hbm_to_vmem [thread:$0]  (!%p1393_p11), %s1678_s4, 16, %s230_s12, [#allocation11]  }
  0x57   : > { %s1477_s18 = sadd.s32 1, %s1291_s25   ;;  %s55_s8 = sadd.s32 1, %s1287_s24 }
  0x58   : > { %s52_s21 = ssub.s32 %s1291_s25, %s1477_s18  ;;  %p62_p8 = scmp.ne.s32.totalorder %s1287_s24, %s1283_s23 }
  0x59   : > { %p53_p4 = scmp.eq.s32.totalorder %s52_s21, 0  ;;  %p63_p13 = scmp.eq.s32.totalorder %s1291_s25, 0 }
  0x5a   : > { %p1052_p6 = scmp.lt.s32.totalorder %s1291_s25, 2  ;;  %p1689_p3 = scmp.eq.s32.totalorder %s1363_s5, 1 }
  0x5b   : > { %s1487_s30 = scalar_select %p53_p4, %s1287_s24, %s55_s8  }
  0x5c   : > { %p64_p10 = por %p63_p13, %p62_p8  ;;  %p1491_p5 = por %p1689_p3, %p62_p8 }
  0x5d   : > { %s243_s11 = sand.u32 1, %s1287_s24   ;;  %s866_s13 = sshll.u32 %s1291_s25, 11 }
  0x5e   : > { %s816_s12 = sshll.u32 %s243_s11, 7  ;;  %s1500_s16 = scalar_lea.hbm %s1675_s1, %s866_s13 }
  0x5f   : > { %s247_s17 = scalar_lea.vmem [#allocation4], %s816_s12  ;;  %p1502_p11 = pnand %p1052_p6, %p64_p10 }
  0x60   : > { %s254_s19 = sshll.u32 %s247_s17, 4  ;;  %s1508_s7 = scalar_lea.sflag [#allocation5], %s243_s11  ;;  %s1506_s19 = int_to_ptr.vmem [resolvable:$true] %s254_s19 }
  0x61   : > { %s1187_s20 = scalar_lea.hbm %s1500_s16, 2048  ;;  %p1189_p9 = pneg %p1502_p11 }
  0x62   : > { %p1188_p7 = scmp.ne.s32.totalorder %s1500_s16, %s1187_s20  ;;  %s1192_s13 = scalar_lea.hbm %s1675_s1, 4096 }
  0x63   : > { %p1193_p1 = scmp.lt.u32.totalorder %s1500_s16, %s1675_s1  ;;  %p1194_p2 = scmp.lt.u32.totalorder %s1192_s13, %s1187_s20 }
  0x64   : > { %p1190_p12 = pnand %p1189_p9, %p1188_p7  ;;  %p1196_p8 = scmp.lt.u32.totalorder %s1187_s20, %s1500_s16 }
  0x65   : > { %p1195_p4 = por %p1194_p2, %p1193_p1 }
  0x66   : > { %p1191_p0 = pneg %p1190_p12 }
  0x67   : > { %p1197_p13 = por %p1196_p8, %p1195_p4 }
  0x69   : > { %p1198_p6 = pnand %p1197_p13, %p1191_p0 }
  0x6b   : > { %1201 = shalt.err (!%p1198_p6)
}
  0x6c   : > { %s1202_s11 = scalar_lea.vmem %s1506_s19, 2048  ;;  %s1298_s15 = smov [#allocation4]  }
  0x6d   : > { %p1203_p10 = scmp.ne.s32.totalorder %s1506_s19, %s1202_s11  ;;  %s1207_s17 = sshll.u32 %s1298_s15, 4  ;;  %s1208_s17 = int_to_ptr.vmem [resolvable:$false] %s1207_s17 }
  0x6e   : > { %s1209_s21 = scalar_lea.vmem %s1208_s17, 4096  ;;  %p1210_p12 = scmp.lt.s32.totalorder %s1506_s19, %s1208_s17 }
  0x6f   : > { %p1205_p3 = pnand %p1203_p10, %p1189_p9  ;;  %p1211_p1 = scmp.lt.s32.totalorder %s1209_s21, %s1202_s11 }
  0x71   : > { %p1206_p7 = pneg %p1205_p3  ;;  %p1212_p2 = por %p1211_p1, %p1210_p12 }
  0x73   : > { %p1213_p4 = pnand %p1212_p2, %p1206_p7 }
  0x75   : > { %1216 = shalt.err (!%p1213_p4)
}
  0x76   : > { %1044 = dma.hbm_to_vmem [thread:$0]  (!%p1502_p11), %s1500_s16, 2048, %s1506_s19, %s1508_s7, %s1296_s0, %s1296_s0, %s1297_s26  }
  0x77   : > { %p1692_p9 = scmp.ne.s32.totalorder %s1686_s29, 0 }
  0x78   : > { %s1542_s20 = sand.u32 (!%p1692_p9), 1, %s1283_s23   ;;  %p1693_p0 = scmp.ne.s32.totalorder (!%p1692_p9), %s1684_s27, 0 }
  0x79   : > { %266 = sbr.rel (%p1692_p9) target bundleno = 691 (0x2b3), region = 44  ;;  %s820_s8 = sshll.u32 (!%p1692_p9), %s1542_s20, 7 }
  0x7a   : > { %s269_s13 = scalar_lea.sflag (!%p1692_p9), [#allocation5], %s1542_s20  ;;  %s1546_s12 = scalar_lea.vmem (!%p1692_p9), [#allocation4], %s820_s8 }
  0x80   : > { %1262 = dma.done.wait (%p1693_p0), %s269_s13, 2048  }
  0x81   : > { %1264 = vsyncadd (%p1693_p0), %s269_s13, 4294965248  ;;  %p1694_p11 = scmp.eq.s32.totalorder %s1363_s5, 0 }
  0x83   : > { %1266 = dma.done.wait (%p1694_p11), [#allocation8], 528   ;;  %p1695_p8 = pmov %p1694_p11 }
  0x85   : > { %1268 = vsyncadd (%p1695_p8), [#allocation8], 4294966768  ;;  %p1696_p13 = pmov %p1695_p8 }
  0x86   : > { %p1697_p6 = pmov %p1695_p8 }
  0x87   : > { %1270 = dma.done.wait (%p1696_p13), [#allocation11], 16  }
  0x88   : > { %1272 = vsyncadd (%p1697_p6), [#allocation11], 4294967280  ;;  %vm340_vm0 = vcmask 130048   ;;  %v329_v1 = vld [vmem:[#allocation7] sm:$0xff]  ;;  %v330_v2 = vld [vmem:[#allocation7 + $0x8] sm:$0xff]  ;;  %v1299_v23 = vmov 0.0|0.0  }
  0x89   : > { %vm972_vm1 = vmpackc.low %vm340_vm0, %vm340_vm0  ;;  %v331_v3 = vld [vmem:[#allocation7 + $0x10] sm:$0xff]  ;;  %v971_v4 = vpack.c.bf16 %v330_v2, %v329_v1  ;;  %v332_v5 = vld [vmem:[#allocation7 + $0x18] sm:$0xff]  ;;  %983 = vmatprep.subr.bf16.mxu1 %v1299_v23  ;;  %vm1300_vm2 = vmmov 0   ;;  %v1301_v24 = vmov 0.0   ;;  %v1302_v26 = vmov 0   ;;  %s863_s27 = sshll.u32 %s1363_s5, 4 }
  0x8a   : > { %v313_v6 = vld [vmem:[%s1546_s12] sm:$0xff]  ;;  %v977_v7 = vpack.c.bf16 %v332_v5, %v331_v3  ;;  %v314_v8 = vld [vmem:[%s1546_s12 + $0x8] sm:$0xff]  ;;  %v315_v9 = vld [vmem:[%s1546_s12 + $0x10] sm:$0xff]  ;;  %968 = vmatprep.mubr.msk.f32.mxu1 %vm1300_vm2, %v1301_v24  ;;  %1098 = vset.pattern.permute.xlu0 %v1302_v26  ;;  %vm573_vm3 = vcmask 261120   ;;  %s311_s29 = scalar_lea.vmem [#allocation12], %s1542_s20  ;;  %s1630_s19 = scalar_lea.hbm %s1680_s6, %s863_s27 }
  0x8b   : > { %912 = vmatprep.mubr.msk.f32.mxu0 %vm340_vm0, %v313_v6  ;;  %973 = vmatprep.subr.msk.bf16.mxu0 %vm972_vm1, %v971_v4  ;;  %v316_v10 = vld [vmem:[%s1546_s12 + $0x18] sm:$0xff]  ;;  %v317_v11 = vld [vmem:[%s1546_s12 + $0x20] sm:$0xff]  ;;  %v318_v12 = vld [vmem:[%s1546_s12 + $0x28] sm:$0xff]  ;;  %s715_s0 = sshll.u32 %s311_s29, 4  ;;  %s703_s10 = scalar_lea.sflag [#allocation6], %s1542_s20  ;;  %s1632_s0 = int_to_ptr.vmem [resolvable:$true] %s715_s0 }
  0x8c   : > { %976 = vmatpush3.bf16.xpose.msk.msra.mxu0 %vm972_vm1, %v971_v4  ;;  %v319_v13 = vld [vmem:[%s1546_s12 + $0x30] sm:$0xff]  ;;  %v320_v14 = vld [vmem:[%s1546_s12 + $0x38] sm:$0xff]  ;;  %v321_v15 = vld [vmem:[%s1546_s12 + $0x40] sm:$0xff]  ;;  %s1217_s7 = scalar_lea.vmem %s1632_s0, 16  ;;  %s1303_s5 = smov [#allocation12]  }
  0x8d   : > { %979 = vmatprep.subr.msk.bf16.mxu0 %vm972_vm1, %v977_v7  ;;  %v322_v16 = vld [vmem:[%s1546_s12 + $0x48] sm:$0xff]  ;;  %v323_v17 = vld [vmem:[%s1546_s12 + $0x50] sm:$0xff]  ;;  %v324_v18 = vld [vmem:[%s1546_s12 + $0x58] sm:$0xff]  ;;  %p1218_p10 = scmp.ne.s32.totalorder %s1632_s0, %s1217_s7  ;;  %s1221_s14 = sshll.u32 %s1303_s5, 4  ;;  %s1222_s14 = int_to_ptr.vmem [resolvable:$false] %s1221_s14 }
  0x8e   : > { %v325_v19 = vld [vmem:[%s1546_s12 + $0x60] sm:$0xff]  ;;  %v326_v20 = vld [vmem:[%s1546_s12 + $0x68] sm:$0xff]  ;;  %v327_v21 = vld [vmem:[%s1546_s12 + $0x70] sm:$0xff]  ;;  %s1223_s11 = scalar_lea.vmem %s1222_s14, 32  ;;  %p1224_p12 = scmp.lt.s32.totalorder %s1632_s0, %s1222_s14 }
  0x8f   : > { %v328_v22 = vld [vmem:[%s1546_s12 + $0x78] sm:$0xff]  ;;  %v824_v27 = vld [vmem:[#allocation9] ss:$0 sm:$0xff]  ;;  %vm1597_vm4 = vmpackc.low %vm573_vm3, %vm573_vm3  ;;  %p1219_p3 = pnand %p1218_p10, %p1491_p5  ;;  %p1225_p1 = scmp.lt.s32.totalorder %s1223_s11, %s1217_s7 }
  0x90   : > { %v563_v25 = vld [vmem:[#allocation3] sm:$0x1] }
  0x91   : > { %566 = vperm.xlu0 %1098, %v563_v25   ;;  %p1220_p7 = pneg %p1219_p3  ;;  %p1226_p2 = por %p1225_p1, %p1224_p12 }
  0x93   : > { %p1227_p4 = pnand %p1226_p2, %p1220_p7 }
  0x94   : > { %982 = vmatpush3.bf16.xpose.msk.msra.mxu0 %vm972_vm1, %v977_v7 }
  0x9b   : > { %913 = vmatmul.mubr.msk.f32.vlgmr.msra.gmra.mrb[0].mxu0 %vm340_vm0, %v314_v8 }
  0x9c   : > { %915 = vmatprep.mubr.msk.f32.mxu0 %vm340_vm0, %v315_v9 }
  0x9f   : > { %916 = vmatmul.mubr.msk.f32.gmra.mrb[2].mxu0 %vm340_vm0, %v316_v10 }
  0xa0   : > { %918 = vmatprep.mubr.msk.f32.mxu0 %vm340_vm0, %v317_v11 }
  0xa3   : > { %919 = vmatmul.mubr.msk.f32.gmra.mrb[4].mxu0 %vm340_vm0, %v318_v12 }
  0xa4   : > { %921 = vmatprep.mubr.msk.f32.mxu0 %vm340_vm0, %v319_v13 }
  0xa7   : > { %922 = vmatmul.mubr.msk.f32.gmra.mrb[6].mxu0 %vm340_vm0, %v320_v14 }
  0xa8   : > { %924 = vmatprep.mubr.msk.f32.mxu0 %vm340_vm0, %v321_v15 }
  0xab   : > { %925 = vmatmul.mubr.msk.f32.gmra.mrb[8].mxu0 %vm340_vm0, %v322_v16 }
  0xac   : > { %927 = vmatprep.mubr.msk.f32.mxu0 %vm340_vm0, %v323_v17 }
  0xaf   : > { %928 = vmatmul.mubr.msk.f32.gmra.mrb[10].mxu0 %vm340_vm0, %v324_v18 }
  0xb0   : > { %930 = vmatprep.mubr.msk.f32.mxu0 %vm340_vm0, %v325_v19 }
  0xb3   : > { %931 = vmatmul.mubr.msk.f32.gmra.mrb[12].mxu0 %vm340_vm0, %v326_v20 }
  0xb4   : > { %933 = vmatprep.mubr.msk.f32.mxu0 %vm340_vm0, %v327_v21  ;;  %v562_v21 = vld [vmem:[#allocation10] sm:$0x1] }
  0xb7   : > { %934 = vmatmul.mubr.msk.f32.gmra.mrb[14].mxu0 %vm340_vm0, %v328_v22  ;;  %v569_v22 = vlaneseq }
  0xb9   : > { %v570_v24 = vshrl.u32 %v569_v22, 7 }
  0xbb   : > { %v571_v25 = vsub.s32 0, %v570_v24 }
 0x110   : > { %v567_v26 = vpop.permute.xlu0 %566 }
 0x16e   : > { %v914_v28 = vpop.f32.mrb[0].mxu0 }
 0x16f   : > { %v473_v29 = vadd.f32 %v914_v28, %v824_v27  ;;  %v467_v30 = vpop.f32.mrb[1].mxu0 }
 0x170   : > { %v468_v31 = vadd.f32 %v824_v27, %v467_v30 }
 0x171   : > { %v547_v32 = vmax.f32 %v473_v29, 0.0 }
 0x172   : > { %v546_v33 = vmax.f32 %v468_v31, 0.0  ;;  %v917_v34 = vpop.f32.mrb[2].mxu0 }
 0x173   : > { %v483_v35 = vadd.f32 %v917_v34, %v824_v27  ;;  %v477_v36 = vpop.f32.mrb[3].mxu0 }
 0x174   : > { %v984_v38 = vpack.c.bf16 %v547_v32, %v546_v33  ;;  %v478_v39 = vadd.f32 %v824_v27, %v477_v36 }
 0x175   : > { %v549_v40 = vmax.f32 %v483_v35, 0.0 }
 0x176   : > { %v548_v41 = vmax.f32 %v478_v39, 0.0  ;;  %986 = vmatpush3.bf16.xpose.msk.msra.mxu1 %vm1597_vm4, %v984_v38  ;;  %v920_v42 = vpop.f32.mrb[4].mxu0 }
 0x177   : > { %v493_v43 = vadd.f32 %v920_v42, %v824_v27  ;;  %987 = vmatprep.subr.bf16.mxu1 %v1299_v23  ;;  %v487_v44 = vpop.f32.mrb[5].mxu0 }
 0x178   : > { %v988_v45 = vpack.c.bf16 %v549_v40, %v548_v41  ;;  %v488_v46 = vadd.f32 %v824_v27, %v487_v44 }
 0x179   : > { %v551_v47 = vmax.f32 %v493_v43, 0.0 }
 0x17a   : > { %v550_v48 = vmax.f32 %v488_v46, 0.0  ;;  %v923_v49 = vpop.f32.mrb[6].mxu0 }
 0x17b   : > { %v503_v50 = vadd.f32 %v923_v49, %v824_v27  ;;  %v497_v51 = vpop.f32.mrb[7].mxu0 }
 0x17c   : > { %v992_v52 = vpack.c.bf16 %v551_v47, %v550_v48  ;;  %v498_v53 = vadd.f32 %v824_v27, %v497_v51 }
 0x17d   : > { %v553_v54 = vmax.f32 %v503_v50, 0.0 }
 0x17e   : > { %990 = vmatpush3.bf16.xpose.msk.msra.mxu1 %vm1597_vm4, %v988_v45  ;;  %v552_v55 = vmax.f32 %v498_v53, 0.0  ;;  %v926_v56 = vpop.f32.mrb[8].mxu0 }
 0x17f   : > { %991 = vmatprep.subr.bf16.mxu1 %v1299_v23  ;;  %v513_v57 = vadd.f32 %v926_v56, %v824_v27  ;;  %v507_v58 = vpop.f32.mrb[9].mxu0 }
 0x180   : > { %v996_v59 = vpack.c.bf16 %v553_v54, %v552_v55  ;;  %v508_v60 = vadd.f32 %v824_v27, %v507_v58 }
 0x181   : > { %v555_v61 = vmax.f32 %v513_v57, 0.0 }
 0x182   : > { %v554_v62 = vmax.f32 %v508_v60, 0.0  ;;  %v929_v63 = vpop.f32.mrb[10].mxu0 }
 0x183   : > { %v523_v0 = vadd.f32 %v929_v63, %v824_v27  ;;  %v517_v1 = vpop.f32.mrb[11].mxu0 }
 0x184   : > { %v1000_v2 = vpack.c.bf16 %v555_v61, %v554_v62  ;;  %v518_v3 = vadd.f32 %v824_v27, %v517_v1 }
 0x185   : > { %v557_v4 = vmax.f32 %v523_v0, 0.0 }
 0x186   : > { %994 = vmatpush3.bf16.xpose.msk.msra.mxu1 %vm1597_vm4, %v992_v52  ;;  %v556_v5 = vmax.f32 %v518_v3, 0.0  ;;  %v932_v6 = vpop.f32.mrb[12].mxu0 }
 0x187   : > { %995 = vmatprep.subr.bf16.mxu1 %v1299_v23  ;;  %v533_v7 = vadd.f32 %v932_v6, %v824_v27  ;;  %v527_v8 = vpop.f32.mrb[13].mxu0 }
 0x188   : > { %v1004_v9 = vpack.c.bf16 %v557_v4, %v556_v5  ;;  %v528_v10 = vadd.f32 %v824_v27, %v527_v8 }
 0x189   : > { %v559_v11 = vmax.f32 %v533_v7, 0.0 }
 0x18a   : > { %v558_v12 = vmax.f32 %v528_v10, 0.0  ;;  %v935_v13 = vpop.f32.mrb[14].mxu0 }
 0x18b   : > { %v543_v14 = vadd.f32 %v935_v13, %v824_v27  ;;  %v537_v15 = vpop.f32.mrb[15].mxu0 }
 0x18c   : > { %v1008_v16 = vpack.c.bf16 %v559_v11, %v558_v12  ;;  %v538_v17 = vadd.f32 %v824_v27, %v537_v15  ;;  %v572_v27 = vrot.slane %v567_v26, %v571_v25 }
 0x18d   : > { %v561_v18 = vmax.f32 %v543_v14, 0.0 }
 0x18e   : > { %998 = vmatpush3.bf16.xpose.msk.msra.mxu1 %vm1597_vm4, %v996_v59  ;;  %v560_v19 = vmax.f32 %v538_v17, 0.0 }
 0x18f   : > { %999 = vmatprep.subr.bf16.mxu1 %v1299_v23 }
 0x190   : > { %v1012_v20 = vpack.c.bf16 %v561_v18, %v560_v19 }
 0x196   : > { %1002 = vmatpush3.bf16.xpose.msk.msra.mxu1 %vm1597_vm4, %v1000_v2 }
 0x197   : > { %1003 = vmatprep.subr.bf16.mxu1 %v1299_v23 }
 0x19e   : > { %1006 = vmatpush3.bf16.xpose.msk.msra.mxu1 %vm1597_vm4, %v1004_v9 }
 0x19f   : > { %1007 = vmatprep.subr.bf16.mxu1 %v1299_v23 }
 0x1a6   : > { %1010 = vmatpush3.bf16.xpose.msk.msra.mxu1 %vm1597_vm4, %v1008_v16 }
 0x1a7   : > { %1011 = vmatprep.subr.bf16.mxu1 %v1299_v23 }
 0x1ae   : > { %1014 = vmatpush3.bf16.xpose.msk.msra.mxu1 %vm1597_vm4, %v1012_v20 }
 0x1b5   : > { %969 = vmatmul.mubr.msk.f32.vlgmr.msra.gmra.mrb[0].mxu1 %vm573_vm3, %v562_v21 }
 0x288   : > { %v691_v28 = vpop.f32.mrb[0].mxu1 }
 0x289   : > { %v692_v29 = vadd.f32 %v691_v28, %v572_v27  ;;  %v970_v30 = vpop.f32.mrb[1].mxu1 }
 0x28b   : > { %v862_v31 = vmul.f32 -1.442695, %v692_v29 }
 0x28d   : > { %1099 = vpow2.f32 %v862_v31 }
 0x297   : > { %v1100_v23 = vpop.eup %1099 }
 0x298   : > { %v698_v32 = vadd.f32 1.0, %v1100_v23 }
 0x29a   : > { %1101 = vrcp.f32 %v698_v32 }
 0x2a4   : > { %v1102_v33 = vpop.eup %1101 }
 0x2a5   : > { %701 = vst [vmem:[%s311_s29] sm:$0x1] %v1102_v33 }
 0x2a6   : > { %1230 = shalt.err (!%p1227_p4)
}
 0x2a7   : > { %s1231_s15 = scalar_lea.hbm %s1630_s19, 16  ;;  %s1235_s20 = scalar_lea.hbm %s1680_s6, 32 }
 0x2a8   : > { %p1232_p9 = scmp.ne.s32.totalorder %s1630_s19, %s1231_s15  ;;  %p1236_p8 = scmp.lt.u32.totalorder %s1630_s19, %s1680_s6 }
 0x2a9   : > { %p1237_p13 = scmp.lt.u32.totalorder %s1235_s20, %s1231_s15  ;;  %p1239_p10 = scmp.lt.u32.totalorder %s1231_s15, %s1630_s19 }
 0x2aa   : > { %p1233_p0 = pnand %p1232_p9, %p1491_p5 }
 0x2ab   : > { %p1238_p6 = por %p1237_p13, %p1236_p8 }
 0x2ac   : > { %p1234_p11 = pneg %p1233_p0 }
 0x2ad   : > { %p1240_p3 = por %p1239_p10, %p1238_p6 }
 0x2af   : > { %p1241_p7 = pnand %p1240_p3, %p1234_p11 }
 0x2b1   : > { %1244 = shalt.err (!%p1241_p7)
}
 0x2b2   : > { %1029 = dma.vmem_to_hbm [thread:$0]  (%p1491_p5), %s1632_s0, 16, %s1630_s19, %s703_s10  }
 0x2b3 PF: > { %s727_s12 = sand.u32 1, %s1279_s22   ;;  %p1700_p12 = scmp.ne.s32.totalorder %s1685_s28, 0 }
 0x2b4   : > { %p1701_p1 = scmp.ge.s32.totalorder %s1291_s25, 2  ;;  %s728_s27 = scalar_lea.sflag [#allocation6], %s727_s12 }
 0x2b6   : > { %p1046_p2 = pnand %p1701_p1, %p1700_p12 }
 0x2b8   : > { %1274 = dma.done.wait (!%p1046_p2), %s728_s27, 16  }
 0x2b9   : > { %1276 = vsyncadd (!%p1046_p2), %s728_s27, 4294967280  ;;  %p24_p4 = scmp.ge.s32.totalorder %s1477_s18, 4   ;;  %s1702_s22 = smov %s1283_s23 }
 0x2ba   : > { %s1703_s23 = smov %s1287_s24  ;;  %s1704_s24 = smov %s1487_s30 }
 0x2bb   : > { %s1705_s25 = smov %s1477_s18  ;;  %26 = sbr.rel (!%p24_p4) target bundleno = 10 (0xa), region = 101 }
 0x2c2   :  { %732 = vsyncpa [#allocation5], 1 }
 0x2c3   :  { %734 = vsyncpa [#allocation5 + $0x1], 1 }
 0x2c4   :  { %735 = vsyncpa [#allocation8], 1 }
 0x2c5   :  { %736 = vsyncpa [#allocation11], 1 }
 0x2c6   :  { %737 = vsyncpa [#allocation6], 1 }
 0x2c7   :  { %739 = vsyncpa [#allocation6 + $0x1], 1 }

</bundles_post_ra>
